<compile_context>
chip_gen: v6e
topology: v6e:2x2x1
jax: 0.10.0
libtpu: 0.0.40
codegen_flags: <defaults>
</compile_context>

<pallas_src>
import jax
import jax.numpy as jnp
from jax.experimental import pallas as pl
from jax.experimental.pallas import tpu as pltpu


def _dpp_router_kernel(b_ref, x_ref, w_ref, g0_ref, g1_ref, o_ref):
    """One (batch, point-tile) step of the fused DPP router.

    b_ref : (1, 1)          SMEM  -- 2 * fused bias (scalar).
    x_ref : (1, C, TILE_N)  VMEM  -- features in native (B, C, N) layout (points lane-dense).
    w_ref : (C, 1)          VMEM  -- 2 * fused gate weight (W2 @ W1).T, grid-resident.
    g0_ref: (1, 1, TILE_N)  VMEM  -- gumbel noise added to logit  +h.
    g1_ref: (1, 1, TILE_N)  VMEM  -- gumbel noise added to logit  -h.
    o_ref : (1, 1, TILE_N)  VMEM  -- hard routing decision in {0, 1}.
    """
    x = x_ref[0].astype(jnp.float32)               # (C, TILE_N); upcast after load (v5e-safe)
    w = w_ref[...].astype(jnp.float32)             # (C, 1)
    s = jnp.sum(x * w, axis=0, keepdims=True)      # (1, TILE_N)  sublane reduce -> XLU slot
    # route to branch 0  iff  h + g0 >= -h + g1  iff  2h >= g1 - g0,
    # with 2h = x . (2*w_eff) + 2*b_eff = s + b_ref[0, 0]
    thr = g1_ref[0] - g0_ref[0] - b_ref[0, 0]      # (1, TILE_N)
    o_ref[0] = (s >= thr).astype(o_ref.dtype)


def dpp_router_forward(x_bcn, w1, b1, w2, b2, g0, g1,
                       *, tile_n=None, compute_dtype=jnp.float32):
    """DPP router forward.

    Args:
      x_bcn: (B, C, N) input in the PyTorch NCL layout (C = feat_num).
      w1:    gate1.weight, (C, C)  (PyTorch (out, in) layout).
      b1:    gate1.bias,   (C,).
      w2:    gate2.weight, (1, C).
      b2:    gate2.bias,   (1,).
      g0,g1: gumbel noise for the 2-way gumbel-softmax, each (B, N, 1).
      tile_n: points per grid step (auto-chosen multiple of 128 when None).
      compute_dtype: storage dtype for x / w_eff fed to the kernel (fp32 or bf16).

    Returns:
      (B, N, 1) float32 hard routing mask in {0, 1}.
    """
    B, C, N = x_bcn.shape

    # ---- Algebraic fusion of the two Linears (done once, tiny) -------------
    #   gate2(gate1(x)) = x @ (W2 @ W1).T + (b1 @ W2.T + b2)
    w_eff = (w2.astype(jnp.float32) @ w1.astype(jnp.float32)).T            # (C, 1)
    b_eff = (b1.astype(jnp.float32) @ w2.astype(jnp.float32).T
             + b2.astype(jnp.float32))                                     # (1,)

    # Pre-scale by 2 so the kernel compares directly against (g1 - g0).
    w_in = (2.0 * w_eff).astype(compute_dtype)                             # (C, 1)
    b_in = jnp.reshape(2.0 * b_eff, (1, 1)).astype(jnp.float32)            # (1, 1) SMEM scalar

    # Metadata-only relayout: (B, N, 1) -> (B, 1, N) has identical flat layout,
    # so the noise is presented lane-dense to the kernel at zero HBM cost.
    g0_l = jnp.reshape(g0, (B, 1, N)).astype(jnp.float32)
    g1_l = jnp.reshape(g1, (B, 1, N)).astype(jnp.float32)

    x_in = x_bcn.astype(compute_dtype)

    # ---- Tile selection -----------------------------------------------------
    if tile_n is None:
        tile_n = N                                     # full-extent fallback
        for cand in (2048, 1024, 512, 256, 128):
            if N % cand == 0:
                tile_n = cand if N > cand else N
                break
    if N % tile_n != 0:
        tile_n = N                                     # full-extent block (always legal)
    # Keep the double-buffered x block comfortably inside VMEM for large C.
    itemsize = jnp.dtype(compute_dtype).itemsize
    while (tile_n > 512 and C * tile_n * itemsize > (4 << 20)
           and N % (tile_n // 2) == 0):
        tile_n //= 2

    out = pl.pallas_call(
        _dpp_router_kernel,
        out_shape=jax.ShapeDtypeStruct((B, 1, N), jnp.float32),
        grid_spec=pltpu.PrefetchScalarGridSpec(
            num_scalar_prefetch=0,
            grid=(B, N // tile_n),
            in_specs=[
                pl.BlockSpec(memory_space=pltpu.MemorySpace.SMEM),        # 2*b_eff scalar
                pl.BlockSpec((1, C, tile_n), lambda b, n: (b, 0, n)),     # x (native layout)
                pl.BlockSpec((C, 1), lambda b, n: (0, 0)),                # fused weight (resident)
                pl.BlockSpec((1, 1, tile_n), lambda b, n: (b, 0, n)),     # gumbel g0
                pl.BlockSpec((1, 1, tile_n), lambda b, n: (b, 0, n)),     # gumbel g1
            ],
            out_specs=pl.BlockSpec((1, 1, tile_n), lambda b, n: (b, 0, n)),
        ),
        compiler_params=pltpu.CompilerParams(
            dimension_semantics=("parallel", "parallel")),
    )(b_in, x_in, w_in, g0_l, g1_l)

    return out.reshape(B, N, 1)                                           # metadata-only reshape


def _reference(x_bcn, w1, b1, w2, b2, g0, g1):
    """Pure-JAX reference mirroring the PyTorch forward (same gumbel noise)."""
    x = jnp.transpose(x_bcn, (0, 2, 1))                                   # (B, N, C)
    h = x @ w1.T + b1                                                     # gate1
    h = h @ w2.T + b2                                                     # gate2 -> (B, N, 1)
    logits = jnp.stack([h, -h], axis=-1)                                  # (B, N, 1, 2)
    noisy = logits + jnp.stack([g0, g1], axis=-1)                         # tau=1 hard argmax
    return (jnp.argmax(noisy, axis=-1) == 0).astype(jnp.float32)          # (B, N, 1)


if __name__ == "__main__":
    B, C, N = 2, 32, 256          # feat_num = 32, N = 256 points (small demo shapes)
    key = jax.random.PRNGKey(0)
    k = jax.random.split(key, 6)

    # Inputs and deterministic synthetic parameters (PyTorch nn.Linear shapes).
    x = jax.random.normal(k[0], (B, C, N), dtype=jnp.float32)
    w1 = jax.random.normal(k[1], (C, C), dtype=jnp.float32) * 0.1         # gate1.weight (out, in)
    b1 = jax.random.normal(k[2], (C,), dtype=jnp.float32) * 0.1           # gate1.bias
    w2 = jax.random.normal(k[3], (1, C), dtype=jnp.float32) * 0.1         # gate2.weight
    b2 = jax.random.normal(k[4], (1,), dtype=jnp.float32) * 0.1           # gate2.bias

    # Gumbel noise for the 2-way gumbel-softmax (sampled in the wrapper, used in-kernel).
    g = jax.random.gumbel(k[5], (B, N, 1, 2), dtype=jnp.float32)
    g0, g1 = g[..., 0], g[..., 1]                                         # each (B, N, 1)

    ref = _reference(x, w1, b1, w2, b2, g0, g1)

    # fp32 path with default (auto) tiling: must match the reference.
    out = dpp_router_forward(x, w1, b1, w2, b2, g0, g1)
    jax.block_until_ready(out)
    assert out.shape == (B, N, 1), out.shape
    assert jnp.all((out == 0.0) | (out == 1.0)), "output must be hard {0,1}"
    agreement = jnp.mean((out == ref).astype(jnp.float32))
    assert agreement > 0.99, f"kernel/reference mismatch: agreement={agreement}"

    # Explicit small tile (exercises the multi-step grid path).
    out_t128 = dpp_router_forward(x, w1, b1, w2, b2, g0, g1, tile_n=128)
    jax.block_until_ready(out_t128)
    assert jnp.mean((out_t128 == ref).astype(jnp.float32)) > 0.99

    # bf16 storage path (halves HBM traffic for the dominant x read); sign decisions
    # are insensitive to the cast except for measure-zero near-threshold points.
    out_bf16 = dpp_router_forward(x, w1, b1, w2, b2, g0, g1,
                                  compute_dtype=jnp.bfloat16)
    jax.block_until_ready(out_bf16)
    agreement_bf16 = jnp.mean((out_bf16 == ref).astype(jnp.float32))
    assert agreement_bf16 > 0.97, f"bf16 path mismatch: agreement={agreement_bf16}"

    print("KERNEL_OK")
</pallas_src>

<mosaic_0001>
module attributes {stable_mosaic.version = 11 : i64} {
  func.func @_dpp_router_kernel(%arg0: i32, %arg1: i32, %arg2: memref<1x1xf32, #tpu.memory_space<smem>>, %arg3: memref<1x32x256xf32, #tpu.memory_space<vmem>>, %arg4: memref<32x1xf32, #tpu.memory_space<vmem>>, %arg5: memref<1x1x256xf32, #tpu.memory_space<vmem>>, %arg6: memref<1x1x256xf32, #tpu.memory_space<vmem>>, %arg7: memref<1x1x256xf32, #tpu.memory_space<vmem>>) attributes {dimension_semantics = [#tpu.dimension_semantics<parallel>, #tpu.dimension_semantics<parallel>], iteration_bounds = array<i64: 2, 1>, scalar_prefetch = 0 : i64, scratch_operands = 0 : i64, tpu.core_type = #tpu.core_type<tc>, window_params = [{transform_indices = @transform_0, window_bounds = array<i64: 1, 1>}, {transform_indices = @transform_1, window_bounds = array<i64: 1, 32, 256>}, {pipeline_mode = #tpu.pipeline_mode<synchronous>, transform_indices = @transform_2, window_bounds = array<i64: 32, 1>}, {transform_indices = @transform_3, window_bounds = array<i64: 1, 1, 256>}, {transform_indices = @transform_4, window_bounds = array<i64: 1, 1, 256>}, {transform_indices = @transform_5, window_bounds = array<i64: 1, 1, 256>}]} {
    %c0 = arith.constant 0 : index
    %c0_0 = arith.constant 0 : index
    %c0_1 = arith.constant 0 : index
    %0 = vector.load %arg3[%c0, %c0_0, %c0_1] : memref<1x32x256xf32, #tpu.memory_space<vmem>>, vector<1x32x256xf32>
    %1 = vector.shape_cast %0 : vector<1x32x256xf32> to vector<32x256xf32>
    %c0_2 = arith.constant 0 : index
    %c0_3 = arith.constant 0 : index
    %2 = vector.load %arg4[%c0_2, %c0_3] : memref<32x1xf32, #tpu.memory_space<vmem>>, vector<32x1xf32>
    %3 = vector.broadcast %2 : vector<32x1xf32> to vector<32x256xf32>
    %4 = arith.mulf %1, %3 : vector<32x256xf32>
    %cst = arith.constant dense<0.000000e+00> : vector<256xf32>
    %5 = vector.multi_reduction <add>, %4, %cst [0] : vector<32x256xf32> to vector<256xf32>
    %6 = vector.shape_cast %5 : vector<256xf32> to vector<1x256xf32>
    %c0_4 = arith.constant 0 : index
    %c0_5 = arith.constant 0 : index
    %c0_6 = arith.constant 0 : index
    %7 = vector.load %arg6[%c0_4, %c0_5, %c0_6] : memref<1x1x256xf32, #tpu.memory_space<vmem>>, vector<1x1x256xf32>
    %8 = vector.shape_cast %7 : vector<1x1x256xf32> to vector<1x256xf32>
    %c0_7 = arith.constant 0 : index
    %c0_8 = arith.constant 0 : index
    %c0_9 = arith.constant 0 : index
    %9 = vector.load %arg5[%c0_7, %c0_8, %c0_9] : memref<1x1x256xf32, #tpu.memory_space<vmem>>, vector<1x1x256xf32>
    %10 = vector.shape_cast %9 : vector<1x1x256xf32> to vector<1x256xf32>
    %11 = arith.subf %8, %10 : vector<1x256xf32>
    %c0_10 = arith.constant 0 : index
    %c0_11 = arith.constant 0 : index
    %12 = memref.load %arg2[%c0_10, %c0_11] : memref<1x1xf32, #tpu.memory_space<smem>>
    %13 = vector.broadcast %12 : f32 to vector<1x256xf32>
    %14 = arith.subf %11, %13 : vector<1x256xf32>
    %15 = arith.cmpf oge, %6, %14 : vector<1x256xf32>
    %16 = arith.extui %15 : vector<1x256xi1> to vector<1x256xi32>
    %17 = arith.sitofp %16 : vector<1x256xi32> to vector<1x256xf32>
    %c0_12 = arith.constant 0 : index
    %c0_13 = arith.constant 0 : index
    %c0_14 = arith.constant 0 : index
    %18 = vector.load %arg7[%c0_12, %c0_13, %c0_14] : memref<1x1x256xf32, #tpu.memory_space<vmem>>, vector<1x1x256xf32>
    %19 = vector.shape_cast %18 : vector<1x1x256xf32> to vector<1x256xf32>
    %20 = vector.shape_cast %17 : vector<1x256xf32> to vector<1x1x256xf32>
    tpu.vector_store %arg7[%c0_12, %c0_13, %c0_14], %20 {strides = array<i32>} : memref<1x1x256xf32, #tpu.memory_space<vmem>>, vector<1x1x256xf32>,
    return
  }
  func.func @transform_0(%arg0: i32, %arg1: i32) -> (i32, i32) {
    %c0_i32 = arith.constant 0 : i32
    %c0_i32_0 = arith.constant 0 : i32
    %c0_i32_1 = arith.constant 0 : i32
    return %c0_i32, %c0_i32_0 : i32, i32
  }
  func.func @transform_1(%arg0: i32, %arg1: i32) -> (i32, i32, i32) {
    %c0_i32 = arith.constant 0 : i32
    %c0_i32_0 = arith.constant 0 : i32
    return %arg0, %c0_i32, %arg1 : i32, i32, i32
  }
  func.func @transform_2(%arg0: i32, %arg1: i32) -> (i32, i32) {
    %c0_i32 = arith.constant 0 : i32
    %c0_i32_0 = arith.constant 0 : i32
    %c0_i32_1 = arith.constant 0 : i32
    return %c0_i32, %c0_i32_0 : i32, i32
  }
  func.func @transform_3(%arg0: i32, %arg1: i32) -> (i32, i32, i32) {
    %c0_i32 = arith.constant 0 : i32
    %c0_i32_0 = arith.constant 0 : i32
    return %arg0, %c0_i32, %arg1 : i32, i32, i32
  }
  func.func @transform_4(%arg0: i32, %arg1: i32) -> (i32, i32, i32) {
    %c0_i32 = arith.constant 0 : i32
    %c0_i32_0 = arith.constant 0 : i32
    return %arg0, %c0_i32, %arg1 : i32, i32, i32
  }
  func.func @transform_5(%arg0: i32, %arg1: i32) -> (i32, i32, i32) {
    %c0_i32 = arith.constant 0 : i32
    %c0_i32_0 = arith.constant 0 : i32
    return %arg0, %c0_i32, %arg1 : i32, i32, i32
  }
}

</mosaic_0001>

<bundles_post_ra>
// kernel: tpu_custom_call.1
= control target key start
LH: loop header
LB: loop body
LE: loop exit
PB: predicated region body
PF: predicated region fallthrough
CT: control target
= control target key end

     0   :  { %s968_s0 = inlined_call_operand.<no memory space> [shape: f32[1,1], index: 0, kind: input, shape index: {}]   ;;  %s969_s1 = inlined_call_operand.hbm [shape: f32[2,32,256], index: 1, kind: input, shape index: {}]   ;;  %s970_s2 = inlined_call_operand.vmem [shape: f32[32,1], index: 2, kind: input, shape index: {}]   ;;  %s971_s3 = inlined_call_operand.vmem [shape: f32[2,1,256], index: 3, kind: input, shape index: {}]   ;;  %s972_s4 = inlined_call_operand.vmem [shape: f32[2,1,256], index: 4, kind: input, shape index: {}]   ;;  %s973_s5 = inlined_call_operand.hbm [shape: f32[2,1,256], index: 5, kind: output, shape index: {}]  }
   0x1   :  { %10 = sst [smem:[#allocation2]] %s968_s0 }
   0x2   :  { %11 = vsyncpa [#allocation4], 0 }
   0x3   :  { %13 = vsyncpa [#allocation4 + $0x1], 0 }
   0x4   :  { %14 = vsyncpa [#allocation5], 0 }
   0x5   :  { %16 = vsyncpa [#allocation5 + $0x1], 0  ;;  %s805_s20 = smov 0   ;;  %s807_s21 = smov 0  }
   0x6   :  { %s809_s22 = smov 0   ;;  %s811_s23 = smov 0  }
   0x7   :  { %s813_s24 = smov 0   ;;  %s815_s25 = smov 0  }
   0x8 LB: > { %s565_s0 = sadd.s32 4294967295, %s763_s25   ;;  %s566_s26 = sadd.s32 4294967294, %s763_s25   ;;  %s763_s25 = sphi %s815_s25, %s22_s25   ;;  %s759_s24 = sphi %s813_s24, %s984_s24   ;;  %s755_s23 = sphi %s811_s23, %s983_s23   ;;  %s751_s22 = sphi %s809_s22, %s982_s22   ;;  %s747_s21 = sphi %s807_s21, %s981_s21   ;;  %s743_s20 = sphi %s805_s20, %s980_s20  }
   0x9   : > { %s34_s27 = sadd.s32 1, %s759_s24  ;;  %s64_s28 = sadd.s32 1, %s751_s22 }
   0xa   : > { %p36_p0 = scmp.ge.s32.totalorder %s34_s27, 2  ;;  %p71_p1 = scmp.ne.s32.totalorder %s751_s22, %s747_s21 }
   0xb   : > { %p72_p2 = scmp.eq.s32.totalorder %s763_s25, 0  ;;  %p77_p3 = scmp.ne.s32.totalorder %s747_s21, %s743_s20 }
   0xc   : > { %s986_s27 = smov (%p36_p0, %s34_s27), 0  ;;  %p78_p5 = scmp.eq.s32.totalorder %s565_s0, 0 }
   0xd   : > { %p846_p4 = por %p72_p2, %p71_p1  ;;  %s59_s30 = ssub.s32 %s759_s24, %s986_s27 }
   0xe   : > { %p180_p6 = scmp.eq.s32.totalorder %s565_s0, 1  ;;  %p62_p7 = scmp.eq.s32.totalorder %s59_s30, 0 }
   0xf   : > { %p852_p8 = por %p78_p5, %p77_p3  ;;  %p186_p10 = scmp.eq.s32.totalorder %s566_s26, 1 }
  0x10   : > { %p856_p9 = por %p180_p6, %p71_p1  ;;  %p598_p13 = scmp.lt.s32.totalorder %s763_s25, 2 }
  0x11   : > { %s861_s8 = scalar_select %p62_p7, %s751_s22, %s64_s28  }
  0x12   : > { %p863_p11 = por %p186_p10, %p77_p3  ;;  %s212_s10 = sand.u32 1, %s751_s22  }
  0x13   : > { %s569_s11 = sshll.u32 %s212_s10, 6  ;;  %s584_s12 = sshll.u32 %s759_s24, 10 }
  0x14   : > { %s224_s15 = scalar_lea.hbm %s969_s1, %s584_s12  ;;  %s216_s16 = scalar_lea.vmem [#allocation3], %s569_s11 }
  0x15   : > { %s225_s17 = sshll.u32 %s216_s16, 4  ;;  %p876_p0 = pnand %p598_p13, %p846_p4  ;;  %s226_s17 = int_to_ptr.vmem [resolvable:$true] %s225_s17 }
  0x16   : > { %p572_p1 = scmp.ge.s32.totalorder %s763_s25, 1  ;;  %s213_s19 = scalar_lea.sflag [#allocation4], %s212_s10 }
  0x17   : > { %p657_p2 = pneg %p876_p0  ;;  %s668_s0 = scalar_lea.vmem %s226_s17, 1024 }
  0x18   : > { %p669_p3 = scmp.ne.s32.totalorder %s226_s17, %s668_s0  ;;  %s765_s26 = smov [#allocation3]  }
  0x19   : > { %s673_s28 = sshll.u32 %s765_s26, 4  ;;  %s674_s28 = int_to_ptr.vmem [resolvable:$false] %s673_s28 }
  0x1a   : > { %p671_p5 = pnand %p669_p3, %p657_p2  ;;  %s675_s30 = scalar_lea.vmem %s674_s28, 2048 }
  0x1b   : > { %p676_p7 = scmp.lt.s32.totalorder %s226_s17, %s674_s28  ;;  %p677_p10 = scmp.lt.s32.totalorder %s675_s30, %s668_s0 }
  0x1c   : > { %p672_p6 = pneg %p671_p5 }
  0x1d   : > { %p678_p12 = por %p677_p10, %p676_p7 }
  0x1f   : > { %p679_p4 = pnand %p678_p12, %p672_p6 }
  0x21   : > { %682 = shalt.err (!%p679_p4)
}
  0x22   : > { %s766_s29 = smov 256   ;;  %s767_s10 = smov 16  }
  0x23   : > { %593 = dma.hbm_to_vmem [thread:$0]  (!%p876_p0), %s224_s15, 1024, %s226_s17, %s213_s19, %s766_s29, %s766_s29, %s767_s10  }
  0x24   : > { %p257_p13 = scmp.lt.s32.totalorder %s763_s25, 3 }
  0x26   : > { %p258_p2 = pnand %p572_p1, %p257_p13 }
  0x27   : > { %s889_s11 = sand.u32 (!%p258_p2), 1, %s747_s21  }
  0x28   : > { %261 = sbr.rel (%p258_p2) target bundleno = 217 (0xd9), region = 40  ;;  %s573_s12 = sshll.u32 (!%p258_p2), %s889_s11, 6 }
  0x29   : > { %s264_s13 = scalar_lea.sflag (!%p258_p2), [#allocation4], %s889_s11  ;;  %s893_s14 = scalar_lea.vmem (!%p258_p2), [#allocation3], %s573_s12 }
  0x2d   : > { %734 = dma.done.wait (%p852_p8), %s264_s13, 1024  }
  0x2e   : > { %736 = vsyncadd (%p852_p8), %s264_s13, 4294966272  ;;  %v768_v0 = vmov 0   ;;  %v340_v1 = vld [vmem:[%s970_s2 + $0x10] sm:$0xff]  ;;  %v338_v2 = vld [vmem:[%s970_s2] sm:$0xff]  ;;  %p312_p8 = scmp.lt.s32.totalorder %s755_s23, 1  ;;  %s391_s29 = sld [smem:[#allocation2]]  ;;  %v395_v25 = vlaneseq }
  0x2f   : > { %654 = vset.pattern.permute.xlu1 %v768_v0  ;;  %653 = vset.pattern.permute.xlu0 %v768_v0  ;;  %v341_v3 = vld [vmem:[%s970_s2 + $0x18] sm:$0xff]  ;;  %v339_v4 = vld [vmem:[%s970_s2 + $0x8] sm:$0xff]  ;;  %v330_v7 = vld [vmem:[%s893_s14] sm:$0xff]  ;;  %v769_v46 = vmov 1966171168   ;;  %v770_v58 = vmov 0.0  }
  0x30   : > { %354 = vperm.xlu1 %654, %v340_v1   ;;  %344 = vperm.xlu0 %653, %v338_v2   ;;  %s313_s28 = scalar_select %p312_p8, %s755_s23, 1  ;;  %v331_v8 = vld [vmem:[%s893_s14 + $0x8] sm:$0xff]  ;;  %v332_v9 = vld [vmem:[%s893_s14 + $0x10] sm:$0xff]  ;;  %v333_v10 = vld [vmem:[%s893_s14 + $0x18] sm:$0xff]  ;;  %v396_v35 = vshrl.u32 %v395_v25, 7  ;;  %v415_v47 = vunpack.c.l.s4 %v769_v46  ;;  %vm431_vm2 = vcmp.lt.s32.totalorder %v395_v25, 256 }
  0x31   : > { %v334_v11 = vld [vmem:[%s893_s14 + $0x20] sm:$0xff]  ;;  %v335_v12 = vld [vmem:[%s893_s14 + $0x28] sm:$0xff]  ;;  %v336_v19 = vld [vmem:[%s893_s14 + $0x30] sm:$0xff]  ;;  %s585_s18 = sshll.u32 %s755_s23, 5  ;;  %s771_s10 = smov [#allocation6]  }
  0x32   : > { %s575_s30 = sshll.u32 %s313_s28, 1  ;;  %v337_v20 = vld [vmem:[%s893_s14 + $0x38] sm:$0xff]  ;;  %v397_v42 = vsub.s32 0, %v396_v35  ;;  %v401_v45 = vsub.s32 1, %v396_v35  ;;  %v416_v54 = vunpack.c.0.s8 %v415_v47  ;;  %s574_s14 = sshll.u32 %s889_s11, 1 }
  0x33   : > { %s318_s13 = scalar_lea.vmem %s971_s3, %s575_s30  ;;  %s327_s17 = scalar_lea.vmem %s972_s4, %s575_s30 }
  0x34   : > { %359 = vperm.xlu1 %654, %v341_v3   ;;  %349 = vperm.xlu0 %653, %v339_v4   ;;  %v388_v30 = vld [vmem:[%s327_s17] sm:$0x3]  ;;  %v392_v38 = vstv %s391_s29  ;;  %v419_v57 = vsub.s32 %v416_v54, %v396_v35  ;;  %s309_s6 = scalar_lea.vmem [#allocation6], %s574_s14  ;;  %s449_s28 = scalar_lea.hbm %s973_s5, %s585_s18 }
  0x35   : > { %v389_v31 = vld [vmem:[%s318_s13] sm:$0x3]  ;;  %s451_s19 = sshll.u32 %s309_s6, 4  ;;  %s435_s30 = scalar_lea.sflag [#allocation5], %s889_s11  ;;  %s452_s19 = int_to_ptr.vmem [resolvable:$true] %s451_s19 }
  0x36   : > { %v390_v34 = vsub.f32 %v388_v30, %v389_v31  ;;  %s683_s29 = scalar_lea.vmem %s452_s19, 32  ;;  %s687_s12 = sshll.u32 %s771_s10, 4  ;;  %s688_s12 = int_to_ptr.vmem [resolvable:$false] %s687_s12 }
  0x37   : > { %p684_p12 = scmp.ne.s32.totalorder %s452_s19, %s683_s29  ;;  %s689_s23 = scalar_lea.vmem %s688_s12, 64 }
  0x38   : > { %v393_v41 = vsub.f32 %v390_v34, %v392_v38  ;;  %p690_p3 = scmp.lt.s32.totalorder %s452_s19, %s688_s12  ;;  %p691_p5 = scmp.lt.s32.totalorder %s689_s23, %s683_s29 }
  0x39   : > { %p685_p0 = pnand %p684_p12, %p856_p9 }
  0x3a   : > { %v398_v50 = vrot.slane %v393_v41, %v397_v42  ;;  %v402_v53 = vrot.slane %v393_v41, %v401_v45  ;;  %p692_p6 = por %p691_p5, %p690_p3 }
  0x3b   : > { %p686_p1 = pneg %p685_p0 }
  0x3d   : > { %p693_p7 = pnand %p692_p6, %p686_p1 }
  0xab   : > { %v355_v5 = vpop.permute.xlu1 %354  ;;  %v345_v6 = vpop.permute.xlu0 %344 }
  0xac   : > { %v362_v14 = vmul.f32 %v345_v6, %v330_v7  ;;  %v363_v15 = vmul.f32 %v345_v6, %v331_v8  ;;  %v366_v21 = vmul.f32 %v355_v5, %v334_v11  ;;  %v367_v22 = vmul.f32 %v355_v5, %v335_v12 }
  0xaf   : > { %v350_v13 = vpop.permute.xlu0 %349  ;;  %v360_v18 = vpop.permute.xlu1 %359 }
  0xb0   : > { %v364_v16 = vmul.f32 %v350_v13, %v332_v9  ;;  %v365_v17 = vmul.f32 %v350_v13, %v333_v10  ;;  %v368_v26 = vmul.f32 %v360_v18, %v336_v19  ;;  %v369_v27 = vmul.f32 %v360_v18, %v337_v20 }
  0xb2   : > { %v370_v23 = vadd.f32 %v364_v16, %v362_v14  ;;  %v379_v24 = vadd.f32 %v365_v17, %v363_v15 }
  0xb4   : > { %v371_v28 = vadd.f32 %v370_v23, %v366_v21  ;;  %v380_v29 = vadd.f32 %v379_v24, %v367_v22 }
  0xb6   : > { %v372_v32 = vadd.f32 %v371_v28, %v368_v26  ;;  %v381_v33 = vadd.f32 %v380_v29, %v369_v27 }
  0xb8   : > { %v373_v36 = vrot.slane %v372_v32, 4  ;;  %v382_v37 = vrot.slane %v381_v33, 4 }
  0xba   : > { %v374_v39 = vadd.f32 %v373_v36, %v372_v32  ;;  %v383_v40 = vadd.f32 %v382_v37, %v381_v33 }
  0xbc   : > { %v375_v43 = vrot.slane %v374_v39, 2  ;;  %v384_v44 = vrot.slane %v383_v40, 2 }
  0xbe   : > { %v376_v48 = vadd.f32 %v375_v43, %v374_v39  ;;  %v385_v49 = vadd.f32 %v384_v44, %v383_v40 }
  0xc0   : > { %v377_v51 = vrot.slane %v376_v48, 1  ;;  %v386_v52 = vrot.slane %v385_v49, 1 }
  0xc2   : > { %v378_v55 = vadd.f32 %v377_v51, %v376_v48  ;;  %v387_v56 = vadd.f32 %v386_v52, %v385_v49 }
  0xc4   : > { %vm405_vm0 = vcmp.ge.f32.partialorder %v378_v55, %v398_v50  ;;  %vm406_vm1 = vcmp.ge.f32.partialorder %v387_v56, %v402_v53 }
  0xc5   : > { %v577_v59 = vsel %vm405_vm0, 1.0, %v770_v58  ;;  %v578_v60 = vsel %vm406_vm1, 1.0, %v770_v58 }
  0xc6   : > { %v413_v61 = vcombine.low %v577_v59, %v578_v60 }
  0xc8   : > { %v420_v62 = vrot.slane %v413_v61, %v419_v57 }
  0xca   : > { %v427_v63 = vrot.slane %v420_v62, %v419_v57 }
  0xcc   : > { %433 = vst.msk [vmem:[%s309_s6] sm:$0x3] %vm431_vm2, %v427_v63 }
  0xcd   : > { %696 = shalt.err (!%p693_p7)
}
  0xce   : > { %s697_s13 = scalar_lea.hbm %s449_s28, 32  ;;  %s701_s16 = scalar_lea.hbm %s973_s5, 64 }
  0xcf   : > { %p698_p10 = scmp.ne.s32.totalorder %s449_s28, %s697_s13  ;;  %p702_p2 = scmp.lt.s32.totalorder %s449_s28, %s973_s5 }
  0xd0   : > { %p703_p8 = scmp.lt.s32.totalorder %s701_s16, %s697_s13 }
  0xd1   : > { %p699_p4 = pnand %p698_p10, %p856_p9 }
  0xd2   : > { %p704_p12 = por %p703_p8, %p702_p2 }
  0xd3   : > { %p700_p13 = pneg %p699_p4 }
  0xd5   : > { %p705_p0 = pnand %p704_p12, %p700_p13 }
  0xd7   : > { %708 = shalt.err (!%p705_p0)
}
  0xd8   : > { %588 = dma.vmem_to_hbm [thread:$0]  (%p856_p9), %s452_s19, 32, %s449_s28, %s435_s30  }
  0xd9 PF: > { %s463_s18 = sand.u32 1, %s743_s20   ;;  %p979_p1 = scmp.ge.s32.totalorder %s763_s25, 2 }
  0xda   : > { %s464_s6 = scalar_lea.sflag [#allocation5], %s463_s18 }
  0xdb   : > { %p595_p3 = pnand %p979_p1, %p863_p11 }
  0xdd   : > { %p596_p5 = pneg %p595_p3 }
  0xdf   : > { %738 = dma.done.wait (%p596_p5), %s464_s6, 32  }
  0xe0   : > { %740 = vsyncadd (%p596_p5), %s464_s6, 4294967264  ;;  %s22_s25 = sadd.s32 1, %s763_s25   ;;  %s980_s20 = smov %s747_s21 }
  0xe1   : > { %p19_p6 = scmp.ge.s32.totalorder %s22_s25, 4   ;;  %s981_s21 = smov %s751_s22 }
  0xe2   : > { %s982_s22 = smov %s861_s8  ;;  %s983_s23 = smov %s759_s24 }
  0xe3   : > { %s984_s24 = smov %s986_s27  ;;  %21 = sbr.rel (!%p19_p6) target bundleno = 8 (0x8), region = 91 }
  0xe8   :  { %469 = vsyncpa [#allocation4], 1 }
  0xe9   :  { %471 = vsyncpa [#allocation4 + $0x1], 1 }
  0xea   :  { %472 = vsyncpa [#allocation5], 1 }
  0xeb   :  { %474 = vsyncpa [#allocation5 + $0x1], 1 }

</bundles_post_ra>
